<compile_context>
chip_gen: v6e
topology: v6e:2x2x1
jax: 0.10.0
libtpu: 0.0.40
codegen_flags: <defaults>
</compile_context>

<pallas_src>
import functools

import jax
import jax.numpy as jnp
from jax.experimental import pallas as pl
from jax.experimental.pallas import tpu as pltpu

LANES = 128      # TPU vreg lane width
SUBLANES = 8     # TPU vreg sublane count (fp32)


def _round_up(n, m):
    return ((n + m - 1) // m) * m


def _pad2d(a, rows, cols):
    out = jnp.zeros((rows, cols), a.dtype)
    return out.at[: a.shape[0], : a.shape[1]].set(a)


def _xavier_normal(key, shape):
    fan_in, fan_out = shape
    std = (2.0 / (fan_in + fan_out)) ** 0.5
    return std * jax.random.normal(key, shape, dtype=jnp.float32)


# ---------------------------------------------------------------------------
# Kernels
# ---------------------------------------------------------------------------
def _ugrnn_step_kernel(x_ref, h_ref, wu_ref, b_ref, h_out_ref, xh_scr):
    """One fused UGRNN step: a SINGLE matmul against packed [W; U].

       pre = [x | h] @ [[W_g|W_c]; [U_g|U_c]] + [b_g|b_c]
       g   = sigmoid(pre[:, :H]);  c = tanh(pre[:, H:])
       h'  = c + g*(h - c)        (== g*h + (1-g)*c == g*h + (g-1)*(-1)*c)
    """
    inp = x_ref.shape[1]
    hp = h_out_ref.shape[1]
    xh_scr[:, :inp] = x_ref[...]
    xh_scr[:, inp:] = h_ref[...]
    pre = (jnp.dot(xh_scr[...], wu_ref[...], preferred_element_type=jnp.float32)
           + b_ref[...])
    g = jax.nn.sigmoid(pre[:, :hp])
    c = jnp.tanh(pre[:, hp:])
    h = h_ref[...]
    h_out_ref[...] = c + g * (h - c)


def _ugrnn_seq_kernel(x_ref, h0_ref, w_ref, u_ref, b_ref, h_out_ref, h_scr):
    """TT timesteps per grid iteration; grid = (batch_tiles, time_blocks).

    The input projection for the whole block is computed as one tall matmul;
    only h @ U stays on the serial per-step dependency chain. The hidden state
    is carried across time blocks in VMEM scratch (per batch tile).
    """
    ti = pl.program_id(1)
    tt, bt, _ = x_ref.shape
    hp = h_scr.shape[-1]

    @pl.when(ti == 0)
    def _():
        h_scr[...] = h0_ref[...]

    # Time-parallel input projection: ONE (tt*bt, in_p) x (in_p, 2*hp) matmul
    # instead of tt tiny M=bt matmuls serialized on the recurrence.
    x_blk = x_ref[...].reshape(tt * bt, x_ref.shape[-1])
    xp = (jnp.dot(x_blk, w_ref[...], preferred_element_type=jnp.float32)
          + b_ref[...])                                    # (tt*bt, 2*hp)

    u = u_ref[...]
    h = h_scr[...]
    for i in range(tt):                                    # static unroll, tt small
        pre = xp[i * bt:(i + 1) * bt, :] + jnp.dot(
            h, u, preferred_element_type=jnp.float32)
        g = jax.nn.sigmoid(pre[:, :hp])
        c = jnp.tanh(pre[:, hp:])
        h = c + g * (h - c)
        h_out_ref[i] = h
    h_scr[...] = h


# ---------------------------------------------------------------------------
# Wrappers
# ---------------------------------------------------------------------------
@functools.partial(jax.jit,
                   static_argnames=("input_size", "hidden_size", "in_p", "h_p"))
def _ugrnn_step_jit(x, h_pad, WU, b, *, input_size, hidden_size, in_p, h_p):
    """One UGRNNCell.forward() step — fused single-matmul pallas_call.

    h_pad is the (b_p, h_p) padded hidden state, aliased to the output.
    Returns the new padded hidden state.
    """
    batch = x.shape[0]
    b_p = h_pad.shape[0]
    x_p = jnp.pad(x.astype(jnp.float32),
                  ((0, b_p - batch), (0, in_p - input_size)))
    return pl.pallas_call(
        _ugrnn_step_kernel,
        out_shape=jax.ShapeDtypeStruct((b_p, h_p), jnp.float32),
        scratch_shapes=[pltpu.VMEM((b_p, in_p + h_p), jnp.float32)],
        input_output_aliases={1: 0},           # alias h in/out (P8)
    )(x_p, h_pad, WU, b)


@functools.partial(jax.jit,
                   static_argnames=("input_size", "hidden_size", "in_p", "h_p",
                                    "block_t", "block_b"))
def ugrnn_cell_sequence(xs, h0, W, U, b, *, input_size, hidden_size,
                        in_p, h_p, block_t=8, block_b=8):
    """Run the cell over a whole sequence in ONE kernel launch.

    xs: (T, batch, input_size), h0: (batch, hidden_size).
    Returns all hidden states (T, batch, hidden_size).
    """
    assert block_b % SUBLANES == 0
    T, batch, _ = xs.shape
    tt = block_t
    bt = block_b
    b_p = _round_up(batch, bt)
    T_pad = _round_up(T, tt)
    two_hp = 2 * h_p

    # Single pad op (feature / batch / time-tail only); no full zero rewrite.
    xs_p = jnp.pad(xs.astype(jnp.float32),
                   ((0, T_pad - T), (0, b_p - batch), (0, in_p - input_size)))
    h0_p = jnp.pad(h0.astype(jnp.float32),
                   ((0, b_p - batch), (0, h_p - hidden_size)))

    # Explicit VMEM budget (resident W/U/b single-buffered via pl.Buffered(1)).
    f32 = 4
    vmem_bytes = (2 * tt * bt * in_p * f32          # x block (double-buffered)
                  + 2 * tt * bt * h_p * f32         # out block (double-buffered)
                  + in_p * two_hp * f32             # W (single-buffered)
                  + h_p * two_hp * f32              # U (single-buffered)
                  + SUBLANES * two_hp * f32         # b
                  + 2 * bt * h_p * f32              # h0
                  + bt * h_p * f32                  # h scratch
                  + tt * bt * two_hp * f32)         # xp intermediate
    vmem_limit = int(min(max(4 * vmem_bytes, 32 << 20), 64 << 20))

    resident = dict(pipeline_mode=pl.Buffered(buffer_count=1))
    out = pl.pallas_call(
        _ugrnn_seq_kernel,
        out_shape=jax.ShapeDtypeStruct((T_pad, b_p, h_p), jnp.float32),
        grid_spec=pltpu.PrefetchScalarGridSpec(
            num_scalar_prefetch=0,
            grid=(b_p // bt, T_pad // tt),
            in_specs=[
                pl.BlockSpec((tt, bt, in_p), lambda bi, ti: (ti, bi, 0)),        # x block
                pl.BlockSpec((bt, h_p), lambda bi, ti: (bi, 0)),                 # h0
                pl.BlockSpec((in_p, two_hp), lambda bi, ti: (0, 0), **resident),  # W
                pl.BlockSpec((h_p, two_hp), lambda bi, ti: (0, 0), **resident),   # U
                pl.BlockSpec((1, two_hp), lambda bi, ti: (0, 0), **resident),     # b
            ],
            out_specs=pl.BlockSpec((tt, bt, h_p), lambda bi, ti: (ti, bi, 0)),
            scratch_shapes=[pltpu.VMEM((bt, h_p), jnp.float32)],                 # carried h
        ),
        compiler_params=pltpu.CompilerParams(
            dimension_semantics=("parallel", "arbitrary"),   # batch ||, time serial
            vmem_limit_bytes=vmem_limit),
    )(xs_p, h0_p, W, U, b)
    return out[:T, :batch, :hidden_size]


class UGRNNCellPallas:
    """Mirrors the PyTorch UGRNNCell (reset() + forward()) with fused kernels."""

    def __init__(self, key, input_size, hidden_size):
        self.input_size = input_size
        self.hidden_size = hidden_size
        self.in_p = _round_up(max(input_size, 1), LANES)
        self.h_p = _round_up(max(hidden_size, 1), LANES)

        k1, k2, k3, k4 = jax.random.split(key, 4)
        W_g = _xavier_normal(k1, (input_size, hidden_size))
        W_c = _xavier_normal(k2, (input_size, hidden_size))
        U_g = jax.random.orthogonal(k3, hidden_size).astype(jnp.float32)
        U_c = jax.random.orthogonal(k4, hidden_size).astype(jnp.float32)
        b_g = jnp.zeros((hidden_size,), jnp.float32)
        b_c = jnp.zeros((hidden_size,), jnp.float32)
        # unpadded params kept for the pure-JAX reference check
        self.raw = dict(W_g=W_g, W_c=W_c, U_g=U_g, U_c=U_c, b_g=b_g, b_c=b_c)

        # concatenated + lane-padded params, built ONCE here
        self.W = jnp.concatenate(
            [_pad2d(W_g, self.in_p, self.h_p), _pad2d(W_c, self.in_p, self.h_p)], axis=1)
        self.U = jnp.concatenate(
            [_pad2d(U_g, self.h_p, self.h_p), _pad2d(U_c, self.h_p, self.h_p)], axis=1)
        self.b = jnp.concatenate(
            [_pad2d(b_g[None, :], 1, self.h_p), _pad2d(b_c[None, :], 1, self.h_p)], axis=1)
        # packed [W; U] for the single-step kernel (ONE matmul per step)
        self.WU = jnp.concatenate([self.W, self.U], axis=0)

        self.states = None
        self._h_pad = None

    def reset(self, batch_size=1):
        b_p = _round_up(batch_size, SUBLANES)
        self._h_pad = jnp.zeros((b_p, self.h_p), jnp.float32)
        self.states = jnp.zeros((batch_size, self.hidden_size), jnp.float32)

    def forward(self, X_t):
        h_pad = _ugrnn_step_jit(X_t, self._h_pad, self.WU, self.b,
                                input_size=self.input_size,
                                hidden_size=self.hidden_size,
                                in_p=self.in_p, h_p=self.h_p)
        self._h_pad = h_pad
        self.states = h_pad[:X_t.shape[0], :self.hidden_size]
        return self.states


# ---------------------------------------------------------------------------
if __name__ == "__main__":
    input_size, hidden_size = 16, 32
    batch, seq_len = 4, 16

    key = jax.random.PRNGKey(0)
    key, kp, kx = jax.random.split(key, 3)

    cell = UGRNNCellPallas(kp, input_size, hidden_size)
    xs = jax.random.normal(kx, (seq_len, batch, input_size), dtype=jnp.float32)

    # ---- single-step forward (matches UGRNNCell.forward after reset) -------
    cell.reset(batch_size=batch)
    h1 = cell.forward(xs[0])
    h2 = cell.forward(xs[1])
    jax.block_until_ready(h2)

    # ---- fused multi-step forward: whole sequence in ONE pallas_call -------
    h0 = jnp.zeros((batch, hidden_size), jnp.float32)
    hs = ugrnn_cell_sequence(xs, h0, cell.W, cell.U, cell.b,
                             input_size=input_size, hidden_size=hidden_size,
                             in_p=cell.in_p, h_p=cell.h_p,
                             block_t=8, block_b=8)
    jax.block_until_ready(hs)

    # ---- pure-JAX reference (literal PyTorch formula) -----------------------
    def ref_step(x, h, p):
        g = jax.nn.sigmoid(x @ p["W_g"] + h @ p["U_g"] + p["b_g"])
        c = jnp.tanh(x @ p["W_c"] + h @ p["U_c"] + p["b_c"])
        return g * h + (g - 1.0) * -1.0 * c

    h_ref = jnp.zeros((batch, hidden_size), jnp.float32)
    refs = []
    for t in range(seq_len):
        h_ref = ref_step(xs[t], h_ref, cell.raw)
        refs.append(h_ref)
    refs = jnp.stack(refs)

    assert h1.shape == (batch, hidden_size)
    assert hs.shape == (seq_len, batch, hidden_size)
    assert jnp.allclose(h1, refs[0], atol=1e-4, rtol=1e-4), "single-step mismatch"
    assert jnp.allclose(h2, refs[1], atol=1e-4, rtol=1e-4), "two-step state mismatch"
    assert jnp.allclose(hs, refs, atol=1e-4, rtol=1e-4), "sequence mismatch"
    print("KERNEL_OK")
</pallas_src>

<mosaic_0001>
module attributes {stable_mosaic.version = 11 : i64} {
  func.func @_ugrnn_step_kernel(%arg0: memref<8x128xf32, #tpu.memory_space<vmem>>, %arg1: memref<8x128xf32, #tpu.memory_space<vmem>>, %arg2: memref<256x256xf32, #tpu.memory_space<vmem>>, %arg3: memref<1x256xf32, #tpu.memory_space<vmem>>, %arg4: memref<8x128xf32, #tpu.memory_space<vmem>>, %arg5: memref<8x256xf32, #tpu.memory_space<vmem>>) attributes {dimension_semantics = [], scalar_prefetch = 0 : i64, scratch_operands = 1 : i64, tpu.core_type = #tpu.core_type<tc>} {
    %c0 = arith.constant 0 : index
    %c0_0 = arith.constant 0 : index
    %0 = vector.load %arg0[%c0, %c0_0] : memref<8x128xf32, #tpu.memory_space<vmem>>, vector<8x128xf32>
    %c0_1 = arith.constant 0 : index
    %c0_2 = arith.constant 0 : index
    %1 = vector.load %arg5[%c0_1, %c0_2] : memref<8x256xf32, #tpu.memory_space<vmem>>, vector<8x128xf32>
    tpu.vector_store %arg5[%c0_1, %c0_2], %0 {strides = array<i32>} : memref<8x256xf32, #tpu.memory_space<vmem>>, vector<8x128xf32>,
    %c0_3 = arith.constant 0 : index
    %c0_4 = arith.constant 0 : index
    %2 = vector.load %arg1[%c0_3, %c0_4] : memref<8x128xf32, #tpu.memory_space<vmem>>, vector<8x128xf32>
    %c0_5 = arith.constant 0 : index
    %c128 = arith.constant 128 : index
    %3 = vector.load %arg5[%c0_5, %c128] : memref<8x256xf32, #tpu.memory_space<vmem>>, vector<8x128xf32>
    tpu.vector_store %arg5[%c0_5, %c128], %2 {strides = array<i32>} : memref<8x256xf32, #tpu.memory_space<vmem>>, vector<8x128xf32>,
    %c0_6 = arith.constant 0 : index
    %c0_7 = arith.constant 0 : index
    %4 = vector.load %arg5[%c0_6, %c0_7] : memref<8x256xf32, #tpu.memory_space<vmem>>, vector<8x256xf32>
    %c0_8 = arith.constant 0 : index
    %c0_9 = arith.constant 0 : index
    %5 = vector.load %arg2[%c0_8, %c0_9] : memref<256x256xf32, #tpu.memory_space<vmem>>, vector<256x256xf32>
    %cst = arith.constant dense<0.000000e+00> : vector<8x256xf32>
    %6 = tpu.matmul %4, %5, %cst {dimension_numbers = #tpu.dot_dimension_numbers<[1], [0], [0], [1], [0, 0, 1, 1], [], []>} : vector<8x256xf32>, vector<256x256xf32>, vector<8x256xf32> -> vector<8x256xf32>
    %c0_10 = arith.constant 0 : index
    %c0_11 = arith.constant 0 : index
    %7 = vector.load %arg3[%c0_10, %c0_11] : memref<1x256xf32, #tpu.memory_space<vmem>>, vector<1x256xf32>
    %8 = vector.broadcast %7 : vector<1x256xf32> to vector<8x256xf32>
    %9 = arith.addf %6, %8 : vector<8x256xf32>
    %10 = vector.extract_strided_slice %9 {offsets = [0, 0], sizes = [8, 128], strides = [1, 1]} : vector<8x256xf32> to vector<8x128xf32>
    %11 = arith.negf %10 : vector<8x128xf32>
    %12 = math.exp %11 : vector<8x128xf32>
    %cst_12 = arith.constant 1.000000e+00 : f32
    %13 = vector.broadcast %cst_12 : f32 to vector<8x128xf32>
    %14 = arith.addf %13, %12 : vector<8x128xf32>
    %15 = arith.divf %13, %14 : vector<8x128xf32>
    %16 = vector.extract_strided_slice %9 {offsets = [0, 128], sizes = [8, 128], strides = [1, 1]} : vector<8x256xf32> to vector<8x128xf32>
    %17 = math.tanh %16 : vector<8x128xf32>
    %c0_13 = arith.constant 0 : index
    %c0_14 = arith.constant 0 : index
    %18 = vector.load %arg1[%c0_13, %c0_14] : memref<8x128xf32, #tpu.memory_space<vmem>>, vector<8x128xf32>
    %19 = arith.subf %18, %17 : vector<8x128xf32>
    %20 = arith.mulf %15, %19 : vector<8x128xf32>
    %21 = arith.addf %17, %20 : vector<8x128xf32>
    %c0_15 = arith.constant 0 : index
    %c0_16 = arith.constant 0 : index
    %22 = vector.load %arg4[%c0_15, %c0_16] : memref<8x128xf32, #tpu.memory_space<vmem>>, vector<8x128xf32>
    tpu.vector_store %arg4[%c0_15, %c0_16], %21 {strides = array<i32>} : memref<8x128xf32, #tpu.memory_space<vmem>>, vector<8x128xf32>,
    return
  }
}

</mosaic_0001>

<bundles_post_ra>
// kernel: _ugrnn_step_jit.1
= control target key start
LH: loop header
LB: loop body
LE: loop exit
PB: predicated region body
PF: predicated region fallthrough
CT: control target
= control target key end

     0   :  { %9 = vsyncpa [#allocation4], 0  ;;  %s352_s0 = inlined_call_operand.vmem [shape: f32[8,128], index: 0, kind: input, shape index: {}]   ;;  %s353_s1 = inlined_call_operand.hbm [shape: f32[8,128], index: 1, kind: input, shape index: {}, may-alias: {1,4}]   ;;  %s354_s2 = inlined_call_operand.hbm [shape: f32[256,256], index: 2, kind: input, shape index: {}]   ;;  %s355_s3 = inlined_call_operand.vmem [shape: f32[1,256], index: 3, kind: input, shape index: {}]   ;;  %s356_s4 = inlined_call_operand.hbm [shape: f32[8,128], index: 4, kind: output, shape index: {}, may-alias: {1,4}]  }
   0x1   :  { %10 = vsyncpa [#allocation7], 0 }
   0x2   :  { %11 = vsyncpa [#allocation5], 0  ;;  %s303_s15 = smov [#allocation3]   ;;  %s304_s17 = smov [#allocation6]  }
   0x3   :  { %s20_s16 = sshll.u32 %s303_s15, 4  ;;  %s29_s18 = sshll.u32 %s304_s17, 4  ;;  %s21_s16 = int_to_ptr.vmem [resolvable:$true] %s20_s16  ;;  %s30_s18 = int_to_ptr.vmem [resolvable:$true] %s29_s18 }
   0x4   :  { %s245_s19 = scalar_lea.vmem %s21_s16, 128  ;;  %p250_p1 = scmp.lt.s32.totalorder %s21_s16, %s21_s16 }
   0x5   :  { %p246_p0 = scmp.ne.s32.totalorder %s21_s16, %s245_s19  ;;  %p251_p2 = scmp.lt.s32.totalorder %s245_s19, %s245_s19 }
   0x7   :  { %p252_p3 = por %p251_p2, %p250_p1 }
   0x9   :  { %p253_p4 = pnand %p252_p3, %p246_p0 }
   0xb   :  { %256 = shalt.err (!%p253_p4)
}
   0xc   :  { %23 = dma.hbm_to_vmem [thread:$0]  %s353_s1, 128, %s21_s16, [#allocation4]  }
   0xd   :  { %s265_s22 = scalar_lea.vmem %s30_s18, 8192  ;;  %p270_p6 = scmp.lt.s32.totalorder %s30_s18, %s30_s18 }
   0xe   :  { %p266_p5 = scmp.ne.s32.totalorder %s30_s18, %s265_s22  ;;  %p271_p7 = scmp.lt.s32.totalorder %s265_s22, %s265_s22 }
  0x10   :  { %p272_p8 = por %p271_p7, %p270_p6 }
  0x12   :  { %p273_p9 = pnand %p272_p8, %p266_p5 }
  0x14   :  { %276 = shalt.err (!%p273_p9)
}
  0x15   :  { %s305_s23 = smov 256   ;;  %s306_s24 = smov 16  }
  0x16   :  { %35 = dma.hbm_to_vmem [thread:$0]  %s354_s2, 8192, %s30_s18, [#allocation7], %s305_s23, %s305_s23, %s306_s24  }
  0x17   :  { %297 = dma.done.wait [#allocation4], 128  }
  0x18   :  { %298 = vsyncadd [#allocation4], 4294967168 }
  0x19   :  { %299 = dma.done.wait [#allocation7], 8192  }
  0x1a   :  { %300 = vsyncadd [#allocation7], 4294959104  ;;  %v81_v0 = vld [vmem:[#allocation6 + $0xf8] sm:$0xff]  ;;  %v80_v1 = vld [vmem:[#allocation6 + $0xf0] sm:$0xff] }
  0x1b   :  { %v79_v2 = vld [vmem:[#allocation6 + $0xe8] sm:$0xff]  ;;  %126 = vmatprep.subr.mxu0 %v81_v0  ;;  %v78_v3 = vld [vmem:[#allocation6 + $0xe0] sm:$0xff]  ;;  %v77_v4 = vld [vmem:[#allocation6 + $0xd8] sm:$0xff] }
  0x1c   :  { %127 = vmatpush1.msra.mxu0 %v80_v1  ;;  %v76_v5 = vld [vmem:[#allocation6 + $0xd0] sm:$0xff]  ;;  %v75_v6 = vld [vmem:[#allocation6 + $0xc8] sm:$0xff]  ;;  %v74_v7 = vld [vmem:[#allocation6 + $0xc0] sm:$0xff] }
  0x1d   :  { %128 = vmatprep.subr.mxu0 %v79_v2  ;;  %v73_v8 = vld [vmem:[#allocation6 + $0xb8] sm:$0xff]  ;;  %v72_v9 = vld [vmem:[#allocation6 + $0xb0] sm:$0xff]  ;;  %v71_v10 = vld [vmem:[#allocation6 + $0xa8] sm:$0xff]  ;;  %v116_v2 = vlaneseq }
  0x1e   :  { %129 = vmatpush1.msra.mxu0 %v78_v3  ;;  %v70_v11 = vld [vmem:[#allocation6 + $0xa0] sm:$0xff]  ;;  %v69_v12 = vld [vmem:[#allocation6 + $0x98] sm:$0xff]  ;;  %v68_v13 = vld [vmem:[#allocation6 + $0x90] sm:$0xff] }
  0x1f   :  { %130 = vmatprep.subr.mxu0 %v77_v4  ;;  %v67_v14 = vld [vmem:[#allocation6 + $0x88] sm:$0xff]  ;;  %v66_v15 = vld [vmem:[#allocation6 + $0x80] sm:$0xff]  ;;  %v65_v16 = vld [vmem:[#allocation6 + $0x78] sm:$0xff]  ;;  %v117_v3 = vshrl.u32 %v116_v2, 7 }
  0x20   :  { %131 = vmatpush1.msra.mxu0 %v76_v5  ;;  %v64_v17 = vld [vmem:[#allocation6 + $0x70] sm:$0xff]  ;;  %v63_v18 = vld [vmem:[#allocation6 + $0x68] sm:$0xff]  ;;  %v62_v19 = vld [vmem:[#allocation6 + $0x60] sm:$0xff] }
  0x21   :  { %132 = vmatprep.subr.mxu0 %v75_v6  ;;  %v61_v20 = vld [vmem:[#allocation6 + $0x58] sm:$0xff]  ;;  %v60_v21 = vld [vmem:[#allocation6 + $0x50] sm:$0xff]  ;;  %v59_v22 = vld [vmem:[#allocation6 + $0x48] sm:$0xff]  ;;  %v118_v4 = vsub.s32 0, %v117_v3 }
  0x22   :  { %133 = vmatpush1.msra.mxu0 %v74_v7  ;;  %v58_v23 = vld [vmem:[#allocation6 + $0x40] sm:$0xff]  ;;  %v339_v24 = vld [vmem:[#allocation3] sm:$0xff]  ;;  %v56_v26 = vld [vmem:[#allocation6 + $0x30] sm:$0xff] }
  0x23   :  { %134 = vmatprep.subr.mxu0 %v73_v8  ;;  %v57_v25 = vld [vmem:[#allocation6 + $0x38] sm:$0xff]  ;;  %190 = vmatprep.mubr.f32.mxu0 %v339_v24  ;;  %v55_v27 = vld [vmem:[#allocation6 + $0x28] sm:$0xff]  ;;  %v54_v28 = vld [vmem:[#allocation6 + $0x20] sm:$0xff] }
  0x24   :  { %135 = vmatpush1.msra.mxu0 %v72_v9  ;;  %v53_v29 = vld [vmem:[#allocation6 + $0x18] sm:$0xff]  ;;  %v52_v30 = vld [vmem:[#allocation6 + $0x10] sm:$0xff]  ;;  %v51_v31 = vld [vmem:[#allocation6 + $0x8] sm:$0xff] }
  0x25   :  { %136 = vmatprep.subr.mxu0 %v71_v10  ;;  %v50_v32 = vld [vmem:[#allocation6] sm:$0xff]  ;;  %v113_v33 = vld [vmem:[#allocation6 + $0x1f8] sm:$0xff]  ;;  %v112_v34 = vld [vmem:[#allocation6 + $0x1f0] sm:$0xff]  ;;  %v122_v10 = vsub.s32 1, %v117_v3 }
  0x26   :  { %137 = vmatpush1.msra.mxu0 %v70_v11  ;;  %v111_v35 = vld [vmem:[#allocation6 + $0x1e8] sm:$0xff]  ;;  %v110_v36 = vld [vmem:[#allocation6 + $0x1e0] sm:$0xff]  ;;  %v109_v37 = vld [vmem:[#allocation6 + $0x1d8] sm:$0xff] }
  0x27   :  { %138 = vmatprep.subr.mxu0 %v69_v12  ;;  %v108_v38 = vld [vmem:[#allocation6 + $0x1d0] sm:$0xff]  ;;  %v107_v39 = vld [vmem:[#allocation6 + $0x1c8] sm:$0xff]  ;;  %v106_v40 = vld [vmem:[#allocation6 + $0x1c0] sm:$0xff] }
  0x28   :  { %139 = vmatpush1.msra.mxu0 %v68_v13  ;;  %v105_v41 = vld [vmem:[#allocation6 + $0x1b8] sm:$0xff]  ;;  %v104_v42 = vld [vmem:[#allocation6 + $0x1b0] sm:$0xff]  ;;  %v103_v43 = vld [vmem:[#allocation6 + $0x1a8] sm:$0xff] }
  0x29   :  { %140 = vmatprep.subr.mxu0 %v67_v14  ;;  %v102_v44 = vld [vmem:[#allocation6 + $0x1a0] sm:$0xff]  ;;  %v101_v45 = vld [vmem:[#allocation6 + $0x198] sm:$0xff]  ;;  %v100_v46 = vld [vmem:[#allocation6 + $0x190] sm:$0xff] }
  0x2a   :  { %141 = vmatpush1.msra.mxu0 %v66_v15  ;;  %v99_v47 = vld [vmem:[#allocation6 + $0x188] sm:$0xff]  ;;  %v98_v48 = vld [vmem:[#allocation6 + $0x180] sm:$0xff]  ;;  %v97_v49 = vld [vmem:[#allocation6 + $0x178] sm:$0xff] }
  0x2b   :  { %142 = vmatprep.subr.mxu0 %v65_v16  ;;  %v96_v50 = vld [vmem:[#allocation6 + $0x170] sm:$0xff]  ;;  %v95_v51 = vld [vmem:[#allocation6 + $0x168] sm:$0xff]  ;;  %v94_v52 = vld [vmem:[#allocation6 + $0x160] sm:$0xff] }
  0x2c   :  { %143 = vmatpush1.msra.mxu0 %v64_v17  ;;  %v93_v53 = vld [vmem:[#allocation6 + $0x158] sm:$0xff]  ;;  %v92_v54 = vld [vmem:[#allocation6 + $0x150] sm:$0xff]  ;;  %v91_v55 = vld [vmem:[#allocation6 + $0x148] sm:$0xff] }
  0x2d   :  { %144 = vmatprep.subr.mxu0 %v63_v18  ;;  %v90_v56 = vld [vmem:[#allocation6 + $0x140] sm:$0xff]  ;;  %v89_v57 = vld [vmem:[#allocation6 + $0x138] sm:$0xff]  ;;  %v88_v58 = vld [vmem:[#allocation6 + $0x130] sm:$0xff] }
  0x2e   :  { %145 = vmatpush1.msra.mxu0 %v62_v19  ;;  %v87_v59 = vld [vmem:[#allocation6 + $0x128] sm:$0xff]  ;;  %v86_v60 = vld [vmem:[#allocation6 + $0x120] sm:$0xff]  ;;  %v85_v61 = vld [vmem:[#allocation6 + $0x118] sm:$0xff] }
  0x2f   :  { %146 = vmatprep.subr.mxu0 %v61_v20  ;;  %v84_v62 = vld [vmem:[#allocation6 + $0x110] sm:$0xff]  ;;  %v83_v63 = vld [vmem:[#allocation6 + $0x108] sm:$0xff]  ;;  %v82_v0 = vld [vmem:[#allocation6 + $0x100] sm:$0xff] }
  0x30   :  { %147 = vmatpush1.msra.mxu0 %v60_v21  ;;  %v44_v1 = vld [vmem:[%s352_s0] sm:$0xff]  ;;  %s307_s0 = smov [#allocation8]  }
  0x31   :  { %148 = vmatprep.subr.mxu0 %v59_v22  ;;  %v114_v5 = vld [vmem:[%s355_s3] sm:$0x3]  ;;  %s215_s29 = sshll.u32 %s307_s0, 4  ;;  %s216_s29 = int_to_ptr.vmem [resolvable:$true] %s215_s29 }
  0x32   :  { %149 = vmatpush1.msra.mxu0 %v58_v23  ;;  %v119_v6 = vrot.slane %v114_v5, %v118_v4  ;;  %v123_v11 = vrot.slane %v114_v5, %v122_v10  ;;  %s277_s3 = scalar_lea.vmem %s216_s29, 128  ;;  %p282_p11 = scmp.lt.s32.totalorder %s216_s29, %s216_s29 }
  0x33   :  { %150 = vmatprep.subr.mxu0 %v57_v25  ;;  %p278_p10 = scmp.ne.s32.totalorder %s216_s29, %s277_s3  ;;  %p283_p12 = scmp.lt.s32.totalorder %s277_s3, %s277_s3 }
  0x34   :  { %151 = vmatpush1.msra.mxu0 %v56_v26 }
  0x35   :  { %152 = vmatprep.subr.mxu0 %v55_v27  ;;  %p284_p13 = por %p283_p12, %p282_p11 }
  0x36   :  { %153 = vmatpush1.msra.mxu0 %v54_v28 }
  0x37   :  { %154 = vmatprep.subr.mxu0 %v53_v29  ;;  %p285_p0 = pnand %p284_p13, %p278_p10 }
  0x38   :  { %155 = vmatpush1.msra.mxu0 %v52_v30 }
  0x39   :  { %156 = vmatprep.subr.mxu0 %v51_v31 }
  0x3a   :  { %157 = vmatpush1.msra.mxu0 %v50_v32 }
  0x3b   :  { %158 = vmatprep.subr.mxu0 %v113_v33 }
  0x3c   :  { %159 = vmatpush2.msra.mxu0 %v112_v34 }
  0x3d   :  { %160 = vmatprep.subr.mxu0 %v111_v35 }
  0x3e   :  { %161 = vmatpush2.msra.mxu0 %v110_v36 }
  0x3f   :  { %162 = vmatprep.subr.mxu0 %v109_v37 }
  0x40   :  { %163 = vmatpush2.msra.mxu0 %v108_v38 }
  0x41   :  { %164 = vmatprep.subr.mxu0 %v107_v39 }
  0x42   :  { %165 = vmatpush2.msra.mxu0 %v106_v40 }
  0x43   :  { %166 = vmatprep.subr.mxu0 %v105_v41 }
  0x44   :  { %167 = vmatpush2.msra.mxu0 %v104_v42 }
  0x45   :  { %168 = vmatprep.subr.mxu0 %v103_v43 }
  0x46   :  { %169 = vmatpush2.msra.mxu0 %v102_v44 }
  0x47   :  { %170 = vmatprep.subr.mxu0 %v101_v45 }
  0x48   :  { %171 = vmatpush2.msra.mxu0 %v100_v46 }
  0x49   :  { %172 = vmatprep.subr.mxu0 %v99_v47 }
  0x4a   :  { %173 = vmatpush2.msra.mxu0 %v98_v48 }
  0x4b   :  { %174 = vmatprep.subr.mxu0 %v97_v49 }
  0x4c   :  { %175 = vmatpush2.msra.mxu0 %v96_v50 }
  0x4d   :  { %176 = vmatprep.subr.mxu0 %v95_v51 }
  0x4e   :  { %177 = vmatpush2.msra.mxu0 %v94_v52 }
  0x4f   :  { %178 = vmatprep.subr.mxu0 %v93_v53 }
  0x50   :  { %179 = vmatpush2.msra.mxu0 %v92_v54 }
  0x51   :  { %180 = vmatprep.subr.mxu0 %v91_v55 }
  0x52   :  { %181 = vmatpush2.msra.mxu0 %v90_v56 }
  0x53   :  { %182 = vmatprep.subr.mxu0 %v89_v57 }
  0x54   :  { %183 = vmatpush2.msra.mxu0 %v88_v58 }
  0x55   :  { %184 = vmatprep.subr.mxu0 %v87_v59 }
  0x56   :  { %185 = vmatpush2.msra.mxu0 %v86_v60 }
  0x57   :  { %186 = vmatprep.subr.mxu0 %v85_v61 }
  0x58   :  { %187 = vmatpush2.msra.mxu0 %v84_v62 }
  0x59   :  { %188 = vmatprep.subr.mxu0 %v83_v63 }
  0x5a   :  { %189 = vmatpush2.msra.mxu0 %v82_v0 }
  0x5b   :  { %191 = vmatmul.mubr.f32.vlgmr.msra.gmra.mxu0 %v44_v1 }
 0x11b   :  { %v192_v7 = vpop.f32.mrf.mxu0 }
 0x11c   :  { %v193_v8 = vadd.f32 %v192_v7, %v119_v6 }
 0x11d   :  { %v194_v12 = vpop.f32.mrf.mxu0 }
 0x11e   :  { %v225_v9 = vmul.f32 -1.442695, %v193_v8  ;;  %v195_v13 = vadd.f32 %v194_v12, %v123_v11 }
 0x120   :  { %231 = vpow2.f32 %v225_v9 }
 0x121   :  { %233 = vtanh.f32 %v195_v13 }
 0x12d   :  { %v232_v14 = vpop.eup %231 }
 0x12e   :  { %v200_v15 = vadd.f32 1.0, %v232_v14  ;;  %v234_v16 = vpop.eup %233 }
 0x12f   :  { %v205_v17 = vsub.f32 %v339_v24, %v234_v16 }
 0x130   :  { %235 = vrcp.f32 %v200_v15 }
 0x13d   :  { %v236_v18 = vpop.eup %235 }
 0x13e   :  { %v206_v19 = vmul.f32 %v236_v18, %v205_v17 }
 0x140   :  { %v207_v20 = vadd.f32 %v234_v16, %v206_v19 }
 0x142   :  { %208 = vst [vmem:[#allocation8] sm:$0xff] %v207_v20 }
 0x143   :  { %288 = shalt.err (!%p285_p0)
}
 0x144   :  { %218 = dma.vmem_to_hbm [thread:$0]  %s216_s29, 128, %s356_s4, [#allocation5]  }
 0x145   :  { %301 = dma.done.wait [#allocation5], 128  }
 0x146   :  { %302 = vsyncadd [#allocation5], 4294967168 }
 0x147   :  { %222 = vsyncpa [#allocation4], 1 }
 0x148   :  { %223 = vsyncpa [#allocation7], 1 }
 0x149   :  { %224 = vsyncpa [#allocation5], 1 }

</bundles_post_ra>
